<compile_context>
chip_gen: v5e
topology: v5e:2x2
jax: 0.10.0
libtpu: 0.0.40
codegen_flags: <defaults>
</compile_context>

<pallas_src>
import jax
import jax.numpy as jnp
import numpy as np
from jax.experimental import pallas as pl
from jax.experimental.pallas import tpu as pltpu


def _round_up(x, m):
    return (x + m - 1) // m * m


def outconv_kernel(x_ref, w_ref, b_ref, o_ref):
    # x_ref: (tm, Cin_p) ; w_ref: (Cin_p, tn) ; b_ref: (1, tn) ; o_ref: (tm, tn)
    o_ref[...] = (
        jnp.dot(x_ref[...], w_ref[...], preferred_element_type=jnp.float32)
        + b_ref[...]
    )


def outconv_forward(x_ncl, w, b):
    """1x1 Conv1d forward.

    x_ncl: (N, Cin, L) float32  (PyTorch NCL layout)
    w:     (Cout, Cin, 1) float32  (PyTorch Conv1d weight)
    b:     (Cout,) float32
    returns (N, Cout, L) float32
    """
    N, Cin, L = x_ncl.shape
    Cout = w.shape[0]

    # --- layout plumbing (wrapper-side, pure XLA metadata / cheap transposes) ---
    x_rows = jnp.transpose(x_ncl, (0, 2, 1)).reshape(N * L, Cin)   # (M, Cin)
    w_mat = jnp.transpose(w[:, :, 0], (1, 0))                      # (Cin, Cout)

    M = N * L
    Cin_p = _round_up(Cin, 128)      # lane-dense contraction dim
    Cout_p = _round_up(Cout, 128)    # lane-dense output dim -> unmasked vst

    # Row tile: multiple of 8 (sublane), capped for VMEM; Cout tile: one 128-lane block
    # (or bigger if Cout is big and we want fewer grid steps).
    tm = 256 if M >= 256 else _round_up(M, 8)
    tn = 256 if Cout_p >= 256 else Cout_p
    M_p = _round_up(M, tm)

    x_pad = jnp.pad(x_rows, ((0, M_p - M), (0, Cin_p - Cin)))
    w_pad = jnp.pad(w_mat, ((0, Cin_p - Cin), (0, Cout_p - Cout)))
    b_pad = jnp.pad(b.reshape(1, Cout), ((0, 0), (0, Cout_p - Cout)))

    grid = (M_p // tm, Cout_p // tn)

    # Per-step VMEM residency (double-buffered inputs/outputs) + headroom.
    step_bytes = 4 * (tm * Cin_p + Cin_p * tn + 8 * tn + tm * tn)
    vmem_limit = int(min(max(3 * step_bytes, 4 << 20), 48 << 20))

    out_pad = pl.pallas_call(
        outconv_kernel,
        out_shape=jax.ShapeDtypeStruct((M_p, Cout_p), jnp.float32),
        grid_spec=pltpu.PrefetchScalarGridSpec(
            num_scalar_prefetch=0,
            grid=grid,
            in_specs=[
                pl.BlockSpec((tm, Cin_p), lambda i, j: (i, 0)),   # activations: full Cin
                pl.BlockSpec((Cin_p, tn), lambda i, j: (0, j)),   # weights follow Co tile
                pl.BlockSpec((1, tn), lambda i, j: (0, j)),       # bias follows Co tile
            ],
            out_specs=pl.BlockSpec((tm, tn), lambda i, j: (i, j)),
        ),
        compiler_params=pltpu.CompilerParams(
            dimension_semantics=("parallel", "parallel"),
            vmem_limit_bytes=vmem_limit,
        ),
    )(x_pad, w_pad, b_pad)

    out = out_pad[:M, :Cout].reshape(N, L, Cout)                   # strip padding
    return jnp.transpose(out, (0, 2, 1))                           # (N, Cout, L)


def _reference(x_ncl, w, b):
    """Pure-JAX reference mirroring PyTorch Conv1d(kernel_size=1)."""
    y = jnp.einsum("ncl,oc->nol", x_ncl, w[:, :, 0])
    return y + b[None, :, None]


if __name__ == "__main__":
    key = jax.random.PRNGKey(0)
    kx, kw, kb = jax.random.split(key, 3)

    N, Cin, Cout, L = 2, 4, 8, 16
    x = jax.random.normal(kx, (N, Cin, L), jnp.float32)
    w = 0.25 * jax.random.normal(kw, (Cout, Cin, 1), jnp.float32)
    b = 0.10 * jax.random.normal(kb, (Cout,), jnp.float32)

    out = jax.block_until_ready(outconv_forward(x, w, b))
    ref = jax.block_until_ready(_reference(x, w, b))

    assert out.shape == (N, Cout, L), out.shape
    np.testing.assert_allclose(np.asarray(out), np.asarray(ref), atol=1e-5, rtol=1e-5)

    print("KERNEL_OK")
</pallas_src>

<mosaic_0001>
module attributes {stable_mosaic.version = 11 : i64} {
  func.func @outconv_kernel(%arg0: i32, %arg1: i32, %arg2: memref<32x128xf32, #tpu.memory_space<vmem>>, %arg3: memref<128x128xf32, #tpu.memory_space<vmem>>, %arg4: memref<1x128xf32, #tpu.memory_space<vmem>>, %arg5: memref<32x128xf32, #tpu.memory_space<vmem>>) attributes {dimension_semantics = [#tpu.dimension_semantics<parallel>, #tpu.dimension_semantics<parallel>], iteration_bounds = array<i64: 1, 1>, scalar_prefetch = 0 : i64, scratch_operands = 0 : i64, tpu.core_type = #tpu.core_type<tc>, window_params = [{transform_indices = @transform_0, window_bounds = array<i64: 32, 128>}, {transform_indices = @transform_1, window_bounds = array<i64: 128, 128>}, {transform_indices = @transform_2, window_bounds = array<i64: 1, 128>}, {transform_indices = @transform_3, window_bounds = array<i64: 32, 128>}]} {
    %c0 = arith.constant 0 : index
    %c0_0 = arith.constant 0 : index
    %0 = vector.load %arg2[%c0, %c0_0] : memref<32x128xf32, #tpu.memory_space<vmem>>, vector<32x128xf32>
    %c0_1 = arith.constant 0 : index
    %c0_2 = arith.constant 0 : index
    %1 = vector.load %arg3[%c0_1, %c0_2] : memref<128x128xf32, #tpu.memory_space<vmem>>, vector<128x128xf32>
    %cst = arith.constant dense<0.000000e+00> : vector<32x128xf32>
    %2 = tpu.matmul %0, %1, %cst {dimension_numbers = #tpu.dot_dimension_numbers<[1], [0], [0], [1], [0, 0, 1, 1], [], []>} : vector<32x128xf32>, vector<128x128xf32>, vector<32x128xf32> -> vector<32x128xf32>
    %c0_3 = arith.constant 0 : index
    %c0_4 = arith.constant 0 : index
    %3 = vector.load %arg4[%c0_3, %c0_4] : memref<1x128xf32, #tpu.memory_space<vmem>>, vector<1x128xf32>
    %4 = vector.broadcast %3 : vector<1x128xf32> to vector<32x128xf32>
    %5 = arith.addf %2, %4 : vector<32x128xf32>
    %c0_5 = arith.constant 0 : index
    %c0_6 = arith.constant 0 : index
    %6 = vector.load %arg5[%c0_5, %c0_6] : memref<32x128xf32, #tpu.memory_space<vmem>>, vector<32x128xf32>
    tpu.vector_store %arg5[%c0_5, %c0_6], %5 {strides = array<i32>} : memref<32x128xf32, #tpu.memory_space<vmem>>, vector<32x128xf32>,
    return
  }
  func.func @transform_0(%arg0: i32, %arg1: i32) -> (i32, i32) {
    %c0_i32 = arith.constant 0 : i32
    %c0_i32_0 = arith.constant 0 : i32
    return %arg0, %c0_i32 : i32, i32
  }
  func.func @transform_1(%arg0: i32, %arg1: i32) -> (i32, i32) {
    %c0_i32 = arith.constant 0 : i32
    %c0_i32_0 = arith.constant 0 : i32
    return %c0_i32, %arg1 : i32, i32
  }
  func.func @transform_2(%arg0: i32, %arg1: i32) -> (i32, i32) {
    %c0_i32 = arith.constant 0 : i32
    %c0_i32_0 = arith.constant 0 : i32
    return %c0_i32, %arg1 : i32, i32
  }
  func.func @transform_3(%arg0: i32, %arg1: i32) -> (i32, i32) {
    %c0_i32 = arith.constant 0 : i32
    return %arg0, %arg1 : i32, i32
  }
}

</mosaic_0001>

<bundles_post_ra>
// kernel: tpu_custom_call.1
= control target key start
LH: loop header
LB: loop body
LE: loop exit
PB: predicated region body
PF: predicated region fallthrough
CT: control target
= control target key end

     0   :  { %8 = vsyncpa [#allocation3], 0  ;;  %s302_s0 = inlined_call_operand.hbm [shape: f32[32,128], index: 0, kind: input, shape index: {}]   ;;  %s303_s1 = inlined_call_operand.hbm [shape: f32[128,128], index: 1, kind: input, shape index: {}]   ;;  %s304_s2 = inlined_call_operand.vmem [shape: f32[1,128], index: 2, kind: input, shape index: {}]   ;;  %s305_s3 = inlined_call_operand.hbm [shape: f32[32,128], index: 3, kind: output, shape index: {}]  }
   0x1   :  { %9 = vsyncpa [#allocation6], 0 }
   0x2   :  { %10 = vsyncpa [#allocation4], 0  ;;  %s15_s14 = sshll.u32 %s302_s0, 4  ;;  %s256_s15 = smov [#allocation2]   ;;  %s16_s14 = int_to_ptr.hbm [resolvable:$true] %s15_s14 }
   0x3   :  { %s17_s16 = sshll.u32 %s256_s15, 4  ;;  %s28_s19 = sshll.u32 %s303_s1, 4  ;;  %s18_s16 = int_to_ptr.vmem [resolvable:$true] %s17_s16  ;;  %s29_s19 = int_to_ptr.hbm [resolvable:$true] %s28_s19 }
   0x4   :  { %s257_s20 = smov 128   ;;  %s258_s21 = smov 8  }
   0x5   :  { %23 = dma.hbm_to_vmem [thread:$0]  %s16_s14, 512, %s18_s16, [#allocation3], %s257_s20, %s257_s20, %s258_s21  }
   0x6   :  { %s259_s22 = smov [#allocation5]  }
   0x7   :  { %s30_s23 = sshll.u32 %s259_s22, 4  ;;  %s31_s23 = int_to_ptr.vmem [resolvable:$true] %s30_s23 }
   0x8   :  { %36 = dma.hbm_to_vmem [thread:$0]  %s29_s19, 2048, %s31_s23, [#allocation6], %s257_s20, %s257_s20, %s258_s21  }
   0x9   :  { %250 = dma.done.wait [#allocation3], 512  }
   0xa   :  { %251 = vsyncadd [#allocation3], 4294966784 }
   0xb   :  { %252 = dma.done.wait [#allocation6], 2048  }
   0xc   :  { %253 = vsyncadd [#allocation6], 4294965248  ;;  %v66_v0 = vld [vmem:[#allocation5 + $0x78] sm:$0xff]  ;;  %v65_v1 = vld [vmem:[#allocation5 + $0x70] sm:$0xff]  ;;  %s260_s24 = smov [#allocation7]   ;;  %s110_s28 = sshll.u32 %s305_s3, 4  ;;  %s111_s28 = int_to_ptr.hbm [resolvable:$true] %s110_s28 }
   0xd   :  { %125 = vmatpush.msra.mxu2 %v66_v0  ;;  %126 = vmatpush.msra.mxu3 %v66_v0  ;;  %v64_v2 = vld [vmem:[#allocation5 + $0x68] sm:$0xff]  ;;  %v63_v3 = vld [vmem:[#allocation5 + $0x60] sm:$0xff]  ;;  %v62_v4 = vld [vmem:[#allocation5 + $0x58] sm:$0xff]  ;;  %s108_s25 = sshll.u32 %s260_s24, 4  ;;  %s109_s25 = int_to_ptr.vmem [resolvable:$true] %s108_s25 }
   0xe   :  { %71 = vmatpush.msra.mxu0 %v66_v0  ;;  %124 = vmatpush.msra.mxu1 %v66_v0  ;;  %v61_v5 = vld [vmem:[#allocation5 + $0x50] sm:$0xff]  ;;  %v60_v6 = vld [vmem:[#allocation5 + $0x48] sm:$0xff]  ;;  %v59_v7 = vld [vmem:[#allocation5 + $0x40] sm:$0xff] }
   0xf   :  { %128 = vmatpush.msra.mxu2 %v65_v1  ;;  %129 = vmatpush.msra.mxu3 %v65_v1  ;;  %v58_v8 = vld [vmem:[#allocation5 + $0x38] sm:$0xff]  ;;  %v57_v9 = vld [vmem:[#allocation5 + $0x30] sm:$0xff]  ;;  %v56_v10 = vld [vmem:[#allocation5 + $0x28] sm:$0xff] }
  0x10   :  { %72 = vmatpush.msra.mxu0 %v65_v1  ;;  %127 = vmatpush.msra.mxu1 %v65_v1  ;;  %v55_v11 = vld [vmem:[#allocation5 + $0x20] sm:$0xff]  ;;  %v54_v12 = vld [vmem:[#allocation5 + $0x18] sm:$0xff]  ;;  %v53_v13 = vld [vmem:[#allocation5 + $0x10] sm:$0xff] }
  0x11   :  { %131 = vmatpush.msra.mxu2 %v64_v2  ;;  %132 = vmatpush.msra.mxu3 %v64_v2  ;;  %v52_v14 = vld [vmem:[#allocation5 + $0x8] sm:$0xff]  ;;  %v51_v15 = vld [vmem:[#allocation5] sm:$0xff]  ;;  %v49_v16 = vld [vmem:[#allocation2 + $0x10] sm:$0xff] }
  0x12   :  { %73 = vmatpush.msra.mxu0 %v64_v2  ;;  %130 = vmatpush.msra.mxu1 %v64_v2  ;;  %v50_v17 = vld [vmem:[#allocation2 + $0x18] sm:$0xff]  ;;  %v47_v18 = vld [vmem:[#allocation2] sm:$0xff]  ;;  %v48_v19 = vld [vmem:[#allocation2 + $0x8] sm:$0xff] }
  0x13   :  { %134 = vmatpush.msra.mxu2 %v63_v3  ;;  %135 = vmatpush.msra.mxu3 %v63_v3  ;;  %v177_v20 = vld [vmem:[%s304_s2] ss:$0 sm:$0xff] }
  0x14   :  { %74 = vmatpush.msra.mxu0 %v63_v3  ;;  %133 = vmatpush.msra.mxu1 %v63_v3 }
  0x15   :  { %137 = vmatpush.msra.mxu2 %v62_v4  ;;  %138 = vmatpush.msra.mxu3 %v62_v4 }
  0x16   :  { %75 = vmatpush.msra.mxu0 %v62_v4  ;;  %136 = vmatpush.msra.mxu1 %v62_v4 }
  0x17   :  { %140 = vmatpush.msra.mxu2 %v61_v5  ;;  %141 = vmatpush.msra.mxu3 %v61_v5 }
  0x18   :  { %76 = vmatpush.msra.mxu0 %v61_v5  ;;  %139 = vmatpush.msra.mxu1 %v61_v5 }
  0x19   :  { %143 = vmatpush.msra.mxu2 %v60_v6  ;;  %144 = vmatpush.msra.mxu3 %v60_v6 }
  0x1a   :  { %77 = vmatpush.msra.mxu0 %v60_v6  ;;  %142 = vmatpush.msra.mxu1 %v60_v6 }
  0x1b   :  { %146 = vmatpush.msra.mxu2 %v59_v7  ;;  %147 = vmatpush.msra.mxu3 %v59_v7 }
  0x1c   :  { %78 = vmatpush.msra.mxu0 %v59_v7  ;;  %145 = vmatpush.msra.mxu1 %v59_v7 }
  0x1d   :  { %149 = vmatpush.msra.mxu2 %v58_v8  ;;  %150 = vmatpush.msra.mxu3 %v58_v8 }
  0x1e   :  { %79 = vmatpush.msra.mxu0 %v58_v8  ;;  %148 = vmatpush.msra.mxu1 %v58_v8 }
  0x1f   :  { %152 = vmatpush.msra.mxu2 %v57_v9  ;;  %153 = vmatpush.msra.mxu3 %v57_v9 }
  0x20   :  { %80 = vmatpush.msra.mxu0 %v57_v9  ;;  %151 = vmatpush.msra.mxu1 %v57_v9 }
  0x21   :  { %155 = vmatpush.msra.mxu2 %v56_v10  ;;  %156 = vmatpush.msra.mxu3 %v56_v10 }
  0x22   :  { %81 = vmatpush.msra.mxu0 %v56_v10  ;;  %154 = vmatpush.msra.mxu1 %v56_v10 }
  0x23   :  { %158 = vmatpush.msra.mxu2 %v55_v11  ;;  %159 = vmatpush.msra.mxu3 %v55_v11 }
  0x24   :  { %82 = vmatpush.msra.mxu0 %v55_v11  ;;  %157 = vmatpush.msra.mxu1 %v55_v11 }
  0x25   :  { %161 = vmatpush.msra.mxu2 %v54_v12  ;;  %162 = vmatpush.msra.mxu3 %v54_v12 }
  0x26   :  { %83 = vmatpush.msra.mxu0 %v54_v12  ;;  %160 = vmatpush.msra.mxu1 %v54_v12 }
  0x27   :  { %164 = vmatpush.msra.mxu2 %v53_v13  ;;  %165 = vmatpush.msra.mxu3 %v53_v13 }
  0x28   :  { %84 = vmatpush.msra.mxu0 %v53_v13  ;;  %163 = vmatpush.msra.mxu1 %v53_v13 }
  0x29   :  { %167 = vmatpush.msra.mxu2 %v52_v14  ;;  %168 = vmatpush.msra.mxu3 %v52_v14 }
  0x2a   :  { %85 = vmatpush.msra.mxu0 %v52_v14  ;;  %166 = vmatpush.msra.mxu1 %v52_v14 }
  0x2b   :  { %170 = vmatpush.msra.mxu2 %v51_v15  ;;  %171 = vmatpush.msra.mxu3 %v51_v15 }
  0x2c   :  { %93 = vmatmul.f32.vlgmr.msra.gmra.mxu2 %v49_v16  ;;  %96 = vmatmul.f32.vlgmr.msra.gmra.mxu3 %v50_v17 }
  0x2d   :  { %86 = vmatpush.msra.mxu0 %v51_v15  ;;  %169 = vmatpush.msra.mxu1 %v51_v15 }
  0x2e   :  { %87 = vmatmul.f32.vlgmr.msra.gmra.mxu0 %v47_v18  ;;  %90 = vmatmul.f32.vlgmr.msra.gmra.mxu1 %v48_v19 }
  0xab   :  { %v88_v21 = vpop.f32.mrf.mxu0  ;;  %v91_v22 = vpop.f32.mrf.mxu1 }
  0xac   :  { %v89_v23 = vadd.f32 %v177_v20, %v88_v21  ;;  %v92_v24 = vadd.f32 %v177_v20, %v91_v22 }
  0xae   :  { %100 = vst [vmem:[#allocation7] sm:$0xff] %v89_v23 }
  0xaf   :  { %101 = vst [vmem:[#allocation7 + $0x8] sm:$0xff] %v92_v24  ;;  %v94_v25 = vpop.f32.mrf.mxu2  ;;  %v97_v26 = vpop.f32.mrf.mxu3 }
  0xb0   :  { %v95_v27 = vadd.f32 %v177_v20, %v94_v25  ;;  %v98_v28 = vadd.f32 %v177_v20, %v97_v26 }
  0xb2   :  { %102 = vst [vmem:[#allocation7 + $0x10] sm:$0xff] %v95_v27 }
  0xb3   :  { %103 = vst [vmem:[#allocation7 + $0x18] sm:$0xff] %v98_v28 }
  0xb4   :  { %116 = dma.vmem_to_hbm [thread:$0]  %s109_s25, 512, %s111_s28, [#allocation4], %s257_s20, %s257_s20, %s258_s21  }
  0xb5   :  { %254 = dma.done.wait [#allocation4], 512  }
  0xb6   :  { %255 = vsyncadd [#allocation4], 4294966784 }
  0xb7   :  { %121 = vsyncpa [#allocation3], 1 }
  0xb8   :  { %122 = vsyncpa [#allocation6], 1 }
  0xb9   :  { %123 = vsyncpa [#allocation4], 1 }

</bundles_post_ra>
